<compile_context>
chip_gen: v7x
topology: tpu7x:2x2x1
jax: 0.10.0
libtpu: 0.0.40
codegen_flags: <defaults>
</compile_context>

<pallas_src>
import functools
import math

import jax
import jax.numpy as jnp
from jax import lax
from jax.experimental import pallas as pl
from jax.experimental.pallas import tpu as pltpu

_LOG_LO = math.log(1e-8)          # log of the lower prob clamp
_LOG_HI = math.log(1.0 - 1e-8)    # log of the upper prob clamp


def _focal_kernel(*args, gamma, s_valid, tile_s, has_weight, masked):
    if has_weight:
        x_ref, t_ref, cw_ref, out_ref = args
    else:
        x_ref, t_ref, out_ref = args
        cw_ref = None

    j = pl.program_id(1)

    @pl.when(j == 0)
    def _():
        out_ref[...] = jnp.zeros_like(out_ref)

    x = x_ref[...].astype(jnp.float32)        # (bb, C, T) class on sublane
    t = t_ref[...].astype(jnp.int32)          # (bb, 1, T)
    bb, num_c, tsz = x.shape

    # --- log-sum-exp softmax over the class (sublane) axis -------------------
    m = jnp.max(x, axis=1, keepdims=True)                        # (bb, 1, T)
    sumexp = jnp.sum(jnp.exp(x - m), axis=1, keepdims=True)      # (bb, 1, T)

    # gather logit at the target class via class-iota compare (no scatter)
    ids = lax.broadcasted_iota(jnp.int32, (bb, num_c, tsz), 1)
    sel = ids == t                                               # (bb, C, T)
    x_t = jnp.sum(jnp.where(sel, x, 0.0), axis=1, keepdims=True)

    # log p_t, clamped in log-space (== log(clip(p, 1e-8, 1-1e-8)))
    logp = x_t - m - jnp.log(sumexp)
    logp = jnp.clip(logp, _LOG_LO, _LOG_HI)
    p = jnp.exp(logp)                                            # (bb, 1, T)

    omp = 1.0 - p
    if gamma == 2:
        focus = omp * omp
    elif gamma == 1:
        focus = omp
    else:
        focus = omp ** gamma
    focus = jnp.clip(focus, 0.0, 2.0)

    # w * focus * log(p); the (-1) and 1/N are folded in by the wrapper
    loss = focus * logp                                          # (bb, 1, T)
    if has_weight:
        w = cw_ref[...].reshape(1, num_c, 1)                     # (C,1)->(1,C,1)
        w_t = jnp.sum(jnp.where(sel, w, 0.0), axis=1, keepdims=True)
        loss = loss * w_t

    if masked:
        col = j * tile_s + lax.broadcasted_iota(jnp.int32, (bb, 1, tsz), 2)
        loss = jnp.where(col < s_valid, loss, 0.0)

    # accumulate this block's contribution into the resident per-bi partial
    out_ref[...] += jnp.sum(loss, axis=(0, 2), keepdims=True)    # (1, 1, 1)


def robust_focal_loss_2d(logit, target, class_weight=None, *, gamma=2,
                         block_bytes=4 << 20, max_tile_s=65536):
    """logit: (B, C, H, W); target: any shape with B*H*W integer elements."""
    B, C, H, W = logit.shape
    S = H * W
    N = B * S

    # free reshapes of NCHW: class stays second-minor, spatial is lane-dense
    x = logit.reshape(B, C, S)                       # native dtype on the wire
    t_dtype = jnp.int8 if C <= 128 else jnp.int32    # narrow the target stream
    t = target.reshape(B, 1, S).astype(t_dtype)

    bytes_per = jnp.dtype(logit.dtype).itemsize
    s_rounded = ((S + 127) // 128) * 128
    row_bytes = C * s_rounded * bytes_per            # one batch row's logits

    if row_bytes <= block_bytes:
        # whole spatial extent fits in one tile: pack batch rows per block
        tile_s = s_rounded
        bb = min(B, max(1, block_bytes // row_bytes))
        while B % bb:                                # keep bb a divisor of B
            bb -= 1
        n_s = 1
    else:
        bb = 1
        tile_s = (block_bytes // (C * bytes_per)) // 128 * 128
        tile_s = int(max(128, min(tile_s, max_tile_s, s_rounded)))
        n_s = pl.cdiv(S, tile_s)

    n_b = B // bb
    masked = (n_s * tile_s) != S                     # tail lanes need zeroing

    inputs = [x, t]
    in_specs = [
        pl.BlockSpec((bb, C, tile_s), lambda bi, j: (bi, 0, j)),
        pl.BlockSpec((bb, 1, tile_s), lambda bi, j: (bi, 0, j)),
    ]
    has_weight = class_weight is not None
    if has_weight:
        cw = jnp.asarray(class_weight, dtype=jnp.float32).reshape(C, 1)
        inputs.append(cw)
        in_specs.append(pl.BlockSpec((C, 1), lambda bi, j: (0, 0)))

    kernel = functools.partial(
        _focal_kernel, gamma=gamma, s_valid=S, tile_s=tile_s,
        has_weight=has_weight, masked=masked)

    partials = pl.pallas_call(
        kernel,
        out_shape=jax.ShapeDtypeStruct((n_b, 1, 1), jnp.float32),
        grid_spec=pltpu.PrefetchScalarGridSpec(
            num_scalar_prefetch=0,
            grid=(n_b, n_s),
            in_specs=in_specs,
            out_specs=pl.BlockSpec((1, 1, 1), lambda bi, j: (bi, 0, 0)),
        ),
        compiler_params=pltpu.CompilerParams(
            dimension_semantics=("parallel", "arbitrary"),
            vmem_limit_bytes=48 * 1024 * 1024),
    )(*inputs)

    # size_average=True -> mean over all B*H*W pixels
    return -jnp.sum(partials) / N


def _reference_loss(logit, target, gamma=2, class_weight=None):
    B, C, H, W = logit.shape
    x = jnp.transpose(logit, (0, 2, 3, 1)).reshape(-1, C).astype(jnp.float32)
    t = target.reshape(-1)
    prob = jax.nn.softmax(x, axis=1)
    p_t = jnp.take_along_axis(prob, t[:, None], axis=1)
    p_t = jnp.clip(p_t, 1e-8, 1.0 - 1e-8)
    focus = jnp.clip((1.0 - p_t) ** gamma, 0.0, 2.0)
    if class_weight is None:
        w = 1.0
    else:
        w = jnp.asarray(class_weight, jnp.float32)[t][:, None]
    return jnp.mean(-w * focus * jnp.log(p_t))


if __name__ == "__main__":
    key = jax.random.PRNGKey(0)
    k1, k2 = jax.random.split(key)
    B, C, H, W = 2, 4, 16, 16
    logit = jax.random.normal(k1, (B, C, H, W), dtype=jnp.float32)
    target = jax.random.randint(k2, (B, H, W), 0, C, dtype=jnp.int32)

    # unweighted (default) path
    loss = jax.block_until_ready(robust_focal_loss_2d(logit, target))
    ref = _reference_loss(logit, target, gamma=2)
    assert jnp.allclose(loss, ref, rtol=1e-5, atol=1e-6), (loss, ref)

    # weighted path (covers the in-kernel class-weight gather)
    cw = jnp.array([1.0, 2.0, 0.5, 1.5], dtype=jnp.float32)
    loss_w = jax.block_until_ready(robust_focal_loss_2d(logit, target, cw))
    ref_w = _reference_loss(logit, target, gamma=2, class_weight=cw)
    assert jnp.allclose(loss_w, ref_w, rtol=1e-5, atol=1e-6), (loss_w, ref_w)

    print("KERNEL_OK")
</pallas_src>

<mosaic_0001>
module attributes {stable_mosaic.version = 11 : i64} {
  func.func @_focal_kernel(%arg0: i32, %arg1: i32, %arg2: memref<2x4x256xf32, #tpu.memory_space<vmem>>, %arg3: memref<2x1x256xi8, #tpu.memory_space<vmem>>, %arg4: memref<1x1x1xf32, #tpu.memory_space<vmem>>) attributes {dimension_semantics = [#tpu.dimension_semantics<parallel>, #tpu.dimension_semantics<arbitrary>], iteration_bounds = array<i64: 1, 1>, scalar_prefetch = 0 : i64, scratch_operands = 0 : i64, tpu.core_type = #tpu.core_type<tc>, window_params = [{transform_indices = @transform_0, window_bounds = array<i64: 2, 4, 256>}, {transform_indices = @transform_1, window_bounds = array<i64: 2, 1, 256>}, {transform_indices = @transform_2, window_bounds = array<i64: 1, 1, 1>}]} {
    %c0_i32 = arith.constant 0 : i32
    %0 = arith.cmpi eq, %arg1, %c0_i32 : i32
    %1 = arith.extui %0 : i1 to i32
    %c0_i32_0 = arith.constant 0 : i32
    %2 = arith.cmpi ne, %1, %c0_i32_0 : i32
    scf.if %2 {
      %cst_21 = arith.constant 0.000000e+00 : f32
      %41 = vector.broadcast %cst_21 : f32 to vector<1x1x1xf32>
      %c0_22 = arith.constant 0 : index
      %c0_23 = arith.constant 0 : index
      %c0_24 = arith.constant 0 : index
      %42 = vector.load %arg4[%c0_22, %c0_23, %c0_24] : memref<1x1x1xf32, #tpu.memory_space<vmem>>, vector<1x1x1xf32>
      tpu.vector_store %arg4[%c0_22, %c0_23, %c0_24], %41 {strides = array<i32>} : memref<1x1x1xf32, #tpu.memory_space<vmem>>, vector<1x1x1xf32>,
    } else {
    }
    %c0 = arith.constant 0 : index
    %c0_1 = arith.constant 0 : index
    %c0_2 = arith.constant 0 : index
    %3 = vector.load %arg2[%c0, %c0_1, %c0_2] : memref<2x4x256xf32, #tpu.memory_space<vmem>>, vector<2x4x256xf32>
    %c0_3 = arith.constant 0 : index
    %c0_4 = arith.constant 0 : index
    %c0_5 = arith.constant 0 : index
    %4 = vector.load %arg3[%c0_3, %c0_4, %c0_5] : memref<2x1x256xi8, #tpu.memory_space<vmem>>, vector<2x1x256xi8>
    %5 = arith.extsi %4 : vector<2x1x256xi8> to vector<2x1x256xi32>
    %cst = arith.constant dense<0xFF800000> : vector<2x256xf32>
    %6 = vector.multi_reduction <maximumf>, %3, %cst [1] : vector<2x4x256xf32> to vector<2x256xf32>
    %7 = vector.shape_cast %6 : vector<2x256xf32> to vector<2x1x256xf32>
    %8 = vector.broadcast %7 : vector<2x1x256xf32> to vector<2x4x256xf32>
    %9 = arith.subf %3, %8 : vector<2x4x256xf32>
    %10 = math.exp %9 : vector<2x4x256xf32>
    %cst_6 = arith.constant dense<0.000000e+00> : vector<2x256xf32>
    %11 = vector.multi_reduction <add>, %10, %cst_6 [1] : vector<2x4x256xf32> to vector<2x256xf32>
    %12 = vector.shape_cast %11 : vector<2x256xf32> to vector<2x1x256xf32>
    %13 = tpu.iota {dimensions = array<i32: 1>} : vector<2x4x256xi32>
    %14 = vector.broadcast %5 : vector<2x1x256xi32> to vector<2x4x256xi32>
    %15 = arith.cmpi eq, %13, %14 : vector<2x4x256xi32>
    %cst_7 = arith.constant 0.000000e+00 : f32
    %16 = vector.broadcast %cst_7 : f32 to vector<2x4x256xf32>
    %17 = arith.select %15, %3, %16 : vector<2x4x256xi1>, vector<2x4x256xf32>
    %cst_8 = arith.constant dense<0.000000e+00> : vector<2x256xf32>
    %18 = vector.multi_reduction <add>, %17, %cst_8 [1] : vector<2x4x256xf32> to vector<2x256xf32>
    %19 = vector.shape_cast %18 : vector<2x256xf32> to vector<2x1x256xf32>
    %20 = arith.subf %19, %7 : vector<2x1x256xf32>
    %21 = math.log %12 : vector<2x1x256xf32>
    %22 = arith.subf %20, %21 : vector<2x1x256xf32>
    %cst_9 = arith.constant -18.420681 : f32
    %cst_10 = arith.constant -9.99999993E-9 : f32
    %23 = vector.broadcast %cst_9 : f32 to vector<2x1x256xf32>
    %24 = arith.maximumf %23, %22 : vector<2x1x256xf32>
    %25 = vector.broadcast %cst_10 : f32 to vector<2x1x256xf32>
    %26 = arith.minimumf %25, %24 : vector<2x1x256xf32>
    %27 = math.exp %26 : vector<2x1x256xf32>
    %cst_11 = arith.constant 1.000000e+00 : f32
    %28 = vector.broadcast %cst_11 : f32 to vector<2x1x256xf32>
    %29 = arith.subf %28, %27 : vector<2x1x256xf32>
    %30 = arith.mulf %29, %29 : vector<2x1x256xf32>
    %cst_12 = arith.constant 0.000000e+00 : f32
    %cst_13 = arith.constant 2.000000e+00 : f32
    %31 = vector.broadcast %cst_12 : f32 to vector<2x1x256xf32>
    %32 = arith.maximumf %31, %30 : vector<2x1x256xf32>
    %33 = vector.broadcast %cst_13 : f32 to vector<2x1x256xf32>
    %34 = arith.minimumf %33, %32 : vector<2x1x256xf32>
    %35 = arith.mulf %34, %26 : vector<2x1x256xf32>
    %c0_14 = arith.constant 0 : index
    %c0_15 = arith.constant 0 : index
    %c0_16 = arith.constant 0 : index
    %36 = vector.load %arg4[%c0_14, %c0_15, %c0_16] : memref<1x1x1xf32, #tpu.memory_space<vmem>>, vector<1x1x1xf32>
    %cst_17 = arith.constant dense<0.000000e+00> : vector<1xf32>
    %37 = vector.multi_reduction <add>, %35, %cst_17 [0, 2] : vector<2x1x256xf32> to vector<1xf32>
    %38 = vector.shape_cast %37 : vector<1xf32> to vector<1x1x1xf32>
    %39 = arith.addf %36, %38 : vector<1x1x1xf32>
    %c0_18 = arith.constant 0 : index
    %c0_19 = arith.constant 0 : index
    %c0_20 = arith.constant 0 : index
    %40 = vector.load %arg4[%c0_18, %c0_19, %c0_20] : memref<1x1x1xf32, #tpu.memory_space<vmem>>, vector<1x1x1xf32>
    tpu.vector_store %arg4[%c0_18, %c0_19, %c0_20], %39 {strides = array<i32>} : memref<1x1x1xf32, #tpu.memory_space<vmem>>, vector<1x1x1xf32>,
    return
  }
  func.func @transform_0(%arg0: i32, %arg1: i32) -> (i32, i32, i32) {
    %c0_i32 = arith.constant 0 : i32
    %c0_i32_0 = arith.constant 0 : i32
    return %arg0, %c0_i32, %arg1 : i32, i32, i32
  }
  func.func @transform_1(%arg0: i32, %arg1: i32) -> (i32, i32, i32) {
    %c0_i32 = arith.constant 0 : i32
    %c0_i32_0 = arith.constant 0 : i32
    return %arg0, %c0_i32, %arg1 : i32, i32, i32
  }
  func.func @transform_2(%arg0: i32, %arg1: i32) -> (i32, i32, i32) {
    %c0_i32 = arith.constant 0 : i32
    %c0_i32_0 = arith.constant 0 : i32
    %c0_i32_1 = arith.constant 0 : i32
    return %arg0, %c0_i32, %c0_i32_0 : i32, i32, i32
  }
}

</mosaic_0001>

<bundles_post_ra>
// kernel: tpu_custom_call.1
= control target key start
LH: loop header
LB: loop body
LE: loop exit
PB: predicated region body
PF: predicated region fallthrough
CT: control target
= control target key end

     0   :  { %7 = vsyncpa [#allocation3], 0  ;;  %s445_s0 = inlined_call_operand.hbm [shape: f32[2,4,256], index: 0, kind: input, shape index: {}]   ;;  %s446_s1 = inlined_call_operand.vmem [shape: s8[2,1,256], index: 1, kind: input, shape index: {}]   ;;  %s447_s2 = inlined_call_operand.hbm [shape: f32[1,1,1], index: 2, kind: output, shape index: {}]  }
   0x1   :  { %8 = vsyncpa [#allocation4], 0  ;;  %s346_s9 = smov [#allocation2]   ;;  %s298_s13 = scalar_lea.hbm %s445_s0, 256 }
   0x2   :  { %s14_s10 = sshll.u32 %s346_s9, 4  ;;  %p299_p0 = scmp.ne.s32.totalorder %s445_s0, %s298_s13  ;;  %s15_s10 = int_to_ptr.vmem [resolvable:$true] %s14_s10 }
   0x3   :  { %p302_p1 = scmp.lt.u32.totalorder %s298_s13, %s445_s0 }
   0x5   :  { %p304_p2 = pnand %p302_p1, %p299_p0 }
   0x7   :  { %307 = shalt.err (!%p304_p2)
}
   0x8   :  { %s308_s18 = scalar_lea.vmem %s15_s10, 256  ;;  %p313_p4 = scmp.lt.s32.totalorder %s15_s10, %s15_s10 }
   0x9   :  { %p309_p3 = scmp.ne.s32.totalorder %s15_s10, %s308_s18  ;;  %p314_p5 = scmp.lt.s32.totalorder %s308_s18, %s308_s18 }
   0xb   :  { %p315_p6 = por %p314_p5, %p313_p4 }
   0xd   :  { %p316_p7 = pnand %p315_p6, %p309_p3 }
   0xf   :  { %319 = shalt.err (!%p316_p7)
}
  0x10   :  { %s347_s19 = smov 128   ;;  %s348_s20 = smov 8  }
  0x11   :  { %20 = dma.hbm_to_vmem [thread:$0]  %s445_s0, 256, %s15_s10, [#allocation3], %s347_s19, %s347_s19, %s348_s20  }
  0x12   :  { %342 = dma.done.wait [#allocation3], 256  }
  0x13   :  { %343 = vsyncadd [#allocation3], 4294967040  ;;  %vm30_vm0 = vcmask 0   ;;  %v349_v0 = vmov 0.0   ;;  %vm44_vm1 = vcmask 1043456   ;;  %v379_v1 = vld [vmem:[#allocation2] sm:$0xff]  ;;  %v121_v7 = vlaneseq }
  0x14   :  { %31 = vst.msk [vmem:[#allocation5] sm:$0x1] %vm30_vm0, %v349_v0  ;;  %v381_v2 = vld [vmem:[#allocation2 + $0x8] sm:$0xff]  ;;  %v385_v3 = vcombine.high %v379_v1, %v379_v1  ;;  %v45_v5 = vsel %vm44_vm1, %v379_v1, -inf  ;;  %v268_v19 = vld [vmem:[%s446_s1] sm:$0xf]  }
  0x15   :  { %v389_v4 = vcombine.high %v381_v2, %v381_v2  ;;  %v59_v6 = vsel %vm44_vm1, %v381_v2, -inf  ;;  %v46_v8 = vrot.slane %v45_v5, 4  ;;  %v122_v18 = vshrl.u32 %v121_v7, 7  ;;  %s350_s1 = smov [#allocation5]  }
  0x16   :  { %v52_v9 = vsel %vm44_vm1, %v385_v3, -inf  ;;  %v60_v10 = vrot.slane %v59_v6, 4  ;;  %v269_v26 = vunpack.c.0.s8 %v268_v19  ;;  %v270_v30 = vunpack.c.1.s8 %v268_v19  ;;  %s258_s24 = sshll.u32 %s350_s1, 4  ;;  %s259_s24 = int_to_ptr.vmem [resolvable:$true] %s258_s24 }
  0x17   :  { %v66_v11 = vsel %vm44_vm1, %v389_v4, -inf  ;;  %v53_v12 = vrot.slane %v52_v9, 4  ;;  %v47_v14 = vmax.f32 %v45_v5, %v46_v8  ;;  %v125_v29 = vsub.s32 0, %v122_v18  ;;  %s320_s25 = scalar_lea.vmem %s259_s24, 16  ;;  %s324_s26 = scalar_lea.vmem %s259_s24, 32 }
  0x18   :  { %v67_v13 = vrot.slane %v66_v11, 4  ;;  %v61_v15 = vmax.f32 %v59_v6, %v60_v10  ;;  %v129_v35 = vsub.s32 4, %v122_v18  ;;  %p321_p8 = scmp.ne.s32.totalorder %s259_s24, %s320_s25  ;;  %p325_p9 = scmp.lt.s32.totalorder %s259_s24, %s259_s24 }
  0x19   :  { %v54_v16 = vmax.f32 %v52_v9, %v53_v12  ;;  %v48_v20 = vrot.slane %v47_v14, 2  ;;  %v126_v40 = vrot.slane %v269_v26, %v125_v29  ;;  %v134_v41 = vrot.slane %v270_v30, %v125_v29  ;;  %p326_p10 = scmp.lt.s32.totalorder %s324_s26, %s320_s25 }
  0x1a   :  { %v68_v17 = vmax.f32 %v66_v11, %v67_v13  ;;  %v62_v21 = vrot.slane %v61_v15, 2  ;;  %v130_v44 = vrot.slane %v269_v26, %v129_v35  ;;  %v138_v45 = vrot.slane %v270_v30, %v129_v35 }
  0x1b   :  { %v55_v22 = vrot.slane %v54_v16, 2  ;;  %v49_v24 = vmax.f32 %v47_v14, %v48_v20  ;;  %v142_v48 = vrot.slane %v126_v40, %v125_v29  ;;  %v150_v49 = vrot.slane %v134_v41, %v125_v29  ;;  %p327_p11 = por %p326_p10, %p325_p9 }
  0x1c   :  { %v69_v23 = vrot.slane %v68_v17, 2  ;;  %v63_v25 = vmax.f32 %v61_v15, %v62_v21  ;;  %v146_v52 = vrot.slane %v130_v44, %v125_v29  ;;  %v154_v53 = vrot.slane %v138_v45, %v125_v29 }
  0x1d   :  { %v56_v27 = vmax.f32 %v54_v16, %v55_v22  ;;  %v50_v31 = vrot.slane %v49_v24, 1  ;;  %vm155_vm2 = vcmp.eq.s32.totalorder %v122_v18, %v142_v48  ;;  %vm157_vm3 = vcmp.eq.s32.totalorder %v122_v18, %v150_v49  ;;  %p328_p12 = pnand %p327_p11, %p321_p8 }
  0x1e   :  { %v70_v28 = vmax.f32 %v68_v17, %v69_v23  ;;  %v64_v32 = vrot.slane %v63_v25, 1  ;;  %vm156_vm4 = vcmp.eq.s32.totalorder %v122_v18, %v146_v52  ;;  %vm158_vm5 = vcmp.eq.s32.totalorder %v122_v18, %v154_v53 }
  0x1f   :  { %v57_v33 = vrot.slane %v56_v27, 1  ;;  %v402_v36 = vmax.f32 %v49_v24, %v50_v31  ;;  %v159_v54 = vsel %vm155_vm2, %v379_v1, 0.0  ;;  %v161_v55 = vsel %vm157_vm3, %v381_v2, 0.0 }
  0x20   :  { %v71_v34 = vrot.slane %v70_v28, 1  ;;  %v404_v37 = vmax.f32 %v63_v25, %v64_v32  ;;  %v160_v56 = vsel %vm156_vm4, %v385_v3, 0.0  ;;  %v162_v57 = vsel %vm158_vm5, %v389_v4, 0.0 }
  0x21   :  { %v406_v38 = vmax.f32 %v56_v27, %v57_v33  ;;  %v163_v58 = vsel %vm44_vm1, %v159_v54, 0.0  ;;  %v177_v59 = vsel %vm44_vm1, %v161_v55, 0.0  ;;  %v170_v60 = vsel %vm44_vm1, %v160_v56, 0.0 }
  0x22   :  { %v408_v39 = vmax.f32 %v70_v28, %v71_v34  ;;  %v164_v61 = vrot.slane %v163_v58, 4  ;;  %v184_v62 = vsel %vm44_vm1, %v162_v57, 0.0  ;;  %v178_v0 = vrot.slane %v177_v59, 4 }
  0x23   :  { %v77_v42 = vcombine.low %v402_v36, %v406_v38  ;;  %v185_v8 = vrot.slane %v184_v62, 4 }
  0x24   :  { %v78_v43 = vcombine.low %v404_v37, %v408_v39  ;;  %v165_v11 = vadd.f32 %v164_v61, %v163_v58  ;;  %v179_v15 = vadd.f32 %v178_v0, %v177_v59 }
  0x25   :  { %v81_v46 = vsub.f32 %v379_v1, %v77_v42  ;;  %v186_v21 = vadd.f32 %v185_v8, %v184_v62 }
  0x26   :  { %v82_v47 = vsub.f32 %v381_v2, %v78_v43  ;;  %v171_v2 = vrot.slane %v170_v60, 4  ;;  %v166_v24 = vrot.slane %v165_v11, 2  ;;  %v180_v27 = vrot.slane %v179_v15, 2 }
  0x27   :  { %v83_v50 = vmul.f32 1.442695, %v81_v46  ;;  %v187_v33 = vrot.slane %v186_v21, 2 }
  0x28   :  { %v85_v51 = vmul.f32 1.442695, %v82_v47  ;;  %v172_v18 = vadd.f32 %v171_v2, %v170_v60  ;;  %v167_v40 = vadd.f32 %v166_v24, %v165_v11  ;;  %v181_v43 = vadd.f32 %v180_v27, %v179_v15 }
  0x29   :  { %278 = vpow2.f32 %v83_v50  ;;  %v188_v48 = vadd.f32 %v187_v33, %v186_v21 }
  0x2a   :  { %280 = vpow2.f32 %v85_v51  ;;  %v173_v30 = vrot.slane %v172_v18, 2  ;;  %v168_v50 = vrot.slane %v167_v40, 1  ;;  %v182_v51 = vrot.slane %v181_v43, 1 }
  0x2b   :  { %v189_v53 = vrot.slane %v188_v48, 1 }
  0x2c   :  { %v174_v46 = vadd.f32 %v173_v30, %v172_v18  ;;  %v169_v54 = vadd.f32 %v168_v50, %v167_v40  ;;  %v183_v55 = vadd.f32 %v182_v51, %v181_v43 }
  0x2d   :  { %v190_v57 = vadd.f32 %v189_v53, %v188_v48 }
  0x2e   :  { %v175_v52 = vrot.slane %v174_v46, 1  ;;  %v191_v58 = vsub.f32 %v169_v54, %v402_v36  ;;  %v193_v60 = vsub.f32 %v183_v55, %v404_v37 }
  0x30   :  { %v176_v56 = vadd.f32 %v175_v52, %v174_v46 }
  0x32   :  { %v192_v62 = vsub.f32 %v176_v56, %v406_v38 }
  0x33   :  { %v279_v63 = vpop.eup %278 }
  0x34   :  { %v281_v5 = vpop.eup %280  ;;  %v89_v6 = vcombine.high %v279_v63, %v279_v63  ;;  %v93_v1 = vsel %vm44_vm1, %v279_v63, 0.0 }
  0x35   :  { %v90_v7 = vcombine.high %v281_v5, %v281_v5  ;;  %v94_v3 = vrot.slane %v93_v1, 4  ;;  %v107_v4 = vsel %vm44_vm1, %v281_v5, 0.0  ;;  %v194_v5 = vsub.f32 %v190_v57, %v408_v39 }
  0x36   :  { %v100_v9 = vsel %vm44_vm1, %v89_v6, 0.0  ;;  %v108_v10 = vrot.slane %v107_v4, 4 }
  0x37   :  { %v95_v12 = vadd.f32 %v94_v3, %v93_v1  ;;  %v101_v13 = vrot.slane %v100_v9, 4  ;;  %v114_v14 = vsel %vm44_vm1, %v90_v7, 0.0 }
  0x38   :  { %v109_v16 = vadd.f32 %v108_v10, %v107_v4  ;;  %v115_v17 = vrot.slane %v114_v14, 4 }
  0x39   :  { %v96_v19 = vrot.slane %v95_v12, 2  ;;  %v102_v20 = vadd.f32 %v101_v13, %v100_v9 }
  0x3a   :  { %v110_v22 = vrot.slane %v109_v16, 2  ;;  %v116_v23 = vadd.f32 %v115_v17, %v114_v14 }
  0x3b   :  { %v97_v25 = vadd.f32 %v96_v19, %v95_v12  ;;  %v103_v26 = vrot.slane %v102_v20, 2 }
  0x3c   :  { %v111_v28 = vadd.f32 %v110_v22, %v109_v16  ;;  %v117_v29 = vrot.slane %v116_v23, 2 }
  0x3d   :  { %v98_v31 = vrot.slane %v97_v25, 1  ;;  %v104_v32 = vadd.f32 %v103_v26, %v102_v20 }
  0x3e   :  { %v112_v34 = vrot.slane %v111_v28, 1  ;;  %v118_v35 = vadd.f32 %v117_v29, %v116_v23 }
  0x3f   :  { %v99_v41 = vadd.f32 %v98_v31, %v97_v25  ;;  %v105_v42 = vrot.slane %v104_v32, 1 }
  0x40   :  { %v113_v44 = vadd.f32 %v112_v34, %v111_v28  ;;  %v119_v45 = vrot.slane %v118_v35, 1 }
  0x41   :  { %v106_v47 = vadd.f32 %v105_v42, %v104_v32  ;;  %282 = vlog2.f32 %v99_v41 }
  0x42   :  { %v120_v49 = vadd.f32 %v119_v45, %v118_v35  ;;  %284 = vlog2.f32 %v113_v44 }
  0x43   :  { %286 = vlog2.f32 %v106_v47 }
  0x44   :  { %288 = vlog2.f32 %v120_v49  ;;  %v243_v49 = vld [vmem:[#allocation5] sm:$0x1] }
  0x4b   :  { %v283_v59 = vpop.eup %282 }
  0x4c   :  { %v285_v61 = vpop.eup %284  ;;  %v196_v63 = vmul.f32 0.6931472, %v283_v59 }
  0x4d   :  { %v287_v0 = vpop.eup %286  ;;  %v200_v6 = vmul.f32 0.6931472, %v285_v61 }
  0x4e   :  { %v289_v1 = vpop.eup %288  ;;  %v198_v2 = vmul.f32 0.6931472, %v287_v0  ;;  %v203_v7 = vsub.f32 %v191_v58, %v196_v63 }
  0x4f   :  { %v202_v3 = vmul.f32 0.6931472, %v289_v1  ;;  %v205_v4 = vsub.f32 %v193_v60, %v200_v6 }
  0x50   :  { %v204_v8 = vsub.f32 %v192_v62, %v198_v2  ;;  %v207_v9 = vmax.f32 %v203_v7, -18.420681 }
  0x51   :  { %v206_v10 = vsub.f32 %v194_v5, %v202_v3  ;;  %v209_v36 = vmax.f32 %v205_v4, -18.420681 }
  0x52   :  { %v208_v11 = vmax.f32 %v204_v8, -18.420681  ;;  %v211_v12 = vmin.f32 %v207_v9, -1e-08 }
  0x53   :  { %v210_v37 = vmax.f32 %v206_v10, -18.420681  ;;  %v213_v13 = vmin.f32 %v209_v36, -1e-08 }
  0x54   :  { %v212_v14 = vmin.f32 %v208_v11, -1e-08  ;;  %v215_v38 = vmul.f32 1.442695, %v211_v12 }
  0x55   :  { %v214_v15 = vmin.f32 %v210_v37, -1e-08  ;;  %v219_v16 = vmul.f32 1.442695, %v213_v13 }
  0x56   :  { %290 = vpow2.f32 %v215_v38  ;;  %v217_v39 = vmul.f32 1.442695, %v212_v14 }
  0x57   :  { %292 = vpow2.f32 %v219_v16  ;;  %v221_v17 = vmul.f32 1.442695, %v214_v15 }
  0x58   :  { %294 = vpow2.f32 %v217_v39 }
  0x59   :  { %296 = vpow2.f32 %v221_v17 }
  0x60   :  { %v291_v18 = vpop.eup %290 }
  0x61   :  { %v293_v19 = vpop.eup %292  ;;  %v223_v20 = vsub.f32 1.0, %v291_v18 }
  0x62   :  { %v295_v21 = vpop.eup %294  ;;  %v225_v22 = vsub.f32 1.0, %v293_v19 }
  0x63   :  { %v297_v23 = vpop.eup %296  ;;  %v224_v24 = vsub.f32 1.0, %v295_v21  ;;  %v227_v25 = vmul.f32 %v223_v20, %v223_v20 }
  0x64   :  { %v226_v26 = vsub.f32 1.0, %v297_v23  ;;  %v229_v27 = vmul.f32 %v225_v22, %v225_v22 }
  0x65   :  { %v228_v28 = vmul.f32 %v224_v24, %v224_v24  ;;  %v231_v29 = vmax.f32 %v227_v25, 0.0 }
  0x66   :  { %v230_v30 = vmul.f32 %v226_v26, %v226_v26  ;;  %v233_v31 = vmax.f32 %v229_v27, 0.0 }
  0x67   :  { %v232_v32 = vmax.f32 %v228_v28, 0.0  ;;  %v235_v33 = vmin.f32 %v231_v29, 2.0 }
  0x68   :  { %v234_v34 = vmax.f32 %v230_v30, 0.0  ;;  %v237_v35 = vmin.f32 %v233_v31, 2.0 }
  0x69   :  { %v236_v40 = vmin.f32 %v232_v32, 2.0  ;;  %v239_v41 = vmul.f32 %v235_v33, %v211_v12 }
  0x6a   :  { %v238_v42 = vmin.f32 %v234_v34, 2.0  ;;  %v241_v44 = vmul.f32 %v237_v35, %v213_v13 }
  0x6b   :  { %v240_v43 = vmul.f32 %v236_v40, %v212_v14 }
  0x6c   :  { %v242_v45 = vmul.f32 %v238_v42, %v214_v15 }
  0x6d   :  { %v244_v46 = vadd.f32 %v240_v43, %v239_v41 }
  0x6f   :  { %v245_v47 = vadd.f32 %v244_v46, %v241_v44 }
  0x71   :  { %v246_v48 = vadd.f32 %v245_v47, %v242_v45 }
  0x73   :  { %247 = vadd.xlane.f32.xlu0 %v246_v48 }
 0x100   :  { %v248_v50 = vpop.xlane.xlu0 %247 }
 0x101   :  { %v249_v51 = vadd.f32 %v248_v50, %v243_v49 }
 0x103   :  { %251 = vst.msk [vmem:[#allocation5] sm:$0x1] %vm30_vm0, %v249_v51 }
 0x104   :  { %331 = shalt.err (!%p328_p12)
}
 0x105   :  { %s332_s29 = scalar_lea.hbm %s447_s2, 16 }
 0x106   :  { %p333_p13 = scmp.ne.s32.totalorder %s447_s2, %s332_s29  ;;  %p336_p0 = scmp.lt.u32.totalorder %s332_s29, %s447_s2 }
 0x108   :  { %p338_p1 = pnand %p336_p0, %p333_p13 }
 0x10a   :  { %341 = shalt.err (!%p338_p1)
}
 0x10b   :  { %261 = dma.vmem_to_hbm [thread:$0]  %s259_s24, 16, %s447_s2, [#allocation4]  }
 0x10c   :  { %344 = dma.done.wait [#allocation4], 16  }
 0x10d   :  { %345 = vsyncadd [#allocation4], 4294967280 }
 0x10e   :  { %265 = vsyncpa [#allocation3], 1 }
 0x10f   :  { %266 = vsyncpa [#allocation4], 1 }

</bundles_post_ra>
